<compile_context>
chip_gen: v7x
topology: tpu7x:2x2x1
jax: 0.10.0
libtpu: 0.0.40
codegen_flags: <defaults>
</compile_context>

<pallas_src>
import jax
import jax.numpy as jnp
from jax import lax
from jax.experimental import pallas as pl
from jax.experimental.pallas import tpu as pltpu


_NEG_BIG = -1e30  # bias for padded classifier columns -> exp() underflows to 0


def intent_lstm_kernel(x_ref, len_ref, w_ih_t_ref, w_hh_t_ref, b_ref,
                       w_out_t_ref, b_out_ref, out_ref, pre_ref):
    # x_ref:      [T*B, D]   bf16 padded input, time-major (row = t*B + b)
    # len_ref:    [B, 1]     int32 valid lengths (>= 1)
    # w_ih_t_ref: [D, 4H]    bf16 input->gates weight (pre-transposed)
    # w_hh_t_ref: [H, 4H]    bf16 hidden->gates weight (pre-transposed)
    # b_ref:      [1, 4H]    f32 merged bias (b_ih + b_hh)
    # w_out_t_ref:[H, Op]    bf16 classifier weight (pre-transposed, O padded)
    # b_out_ref:  [1, Op]    f32 classifier bias (-1e30 in padded columns)
    # out_ref:    [B, Op]    f32 softmax probabilities (lane-dense store)
    # pre_ref:    [T*B, 4H]  f32 VMEM scratch: hoisted input projection
    TB, _ = x_ref.shape
    Bb = len_ref.shape[0]
    T = TB // Bb
    H = w_hh_t_ref.shape[0]
    G = 4 * H

    # ---- preamble: whole input projection as ONE MXU matmul (+ bias) ----
    pre_ref[...] = (
        jnp.dot(x_ref[...], w_ih_t_ref[...], preferred_element_type=jnp.float32)
        + b_ref[...])

    # ---- loop invariants (hoisted out of the serial recurrence) ----
    w_hh_t = w_hh_t_ref[...]                                  # [H, 4H] bf16
    last_t = len_ref[...] - 1                                 # [B, 1] int32
    lane = lax.broadcasted_iota(jnp.int32, (Bb, G), 1)
    g_lanes = (lane >= 2 * H) & (lane < 3 * H)                # tanh ("g") lanes

    def step(t, carry):
        h, c, last_h = carry
        row = pl.multiple_of(t * Bb, Bb)
        gates = pre_ref[pl.ds(row, Bb), :] + jnp.dot(
            h.astype(w_hh_t.dtype), w_hh_t, preferred_element_type=jnp.float32)
        # full-width EUP passes + lane select instead of 4 sub-vreg slices
        act = jnp.where(g_lanes, jnp.tanh(gates), jax.nn.sigmoid(gates))
        i_g = act[:, 0 * H:1 * H]
        f_g = act[:, 1 * H:2 * H]
        g_g = act[:, 2 * H:3 * H]
        o_g = act[:, 3 * H:4 * H]
        c_new = f_g * c + i_g * g_g
        h_new = o_g * jnp.tanh(c_new)
        # capture hidden state at the last *valid* timestep of each sequence
        last_h = jnp.where(last_t == t, h_new, last_h)
        return h_new, c_new, last_h

    zeros = jnp.zeros((Bb, H), jnp.float32)
    _, _, last_h = lax.fori_loop(0, T, step, (zeros, zeros, zeros), unroll=True)

    # ---- hidden2out + Softmax(dim=1); lane-dense [B, Op] store ----
    logits = (jnp.dot(last_h.astype(w_out_t_ref.dtype), w_out_t_ref[...],
                      preferred_element_type=jnp.float32)
              + b_out_ref[...])
    m = jnp.max(logits, axis=1, keepdims=True)
    e = jnp.exp(logits - m)
    inv = pl.reciprocal(jnp.sum(e, axis=1, keepdims=True), approx=True)
    out_ref[...] = (e * inv).astype(out_ref.dtype)


def _round_up(n, m):
    return ((n + m - 1) // m) * m


def intent_cls_forward(x_btd, lengths, params):
    """x_btd: [B, T, D] (batch_first, like the PyTorch module). lengths: [B] int32 (>=1)."""
    B, T, D = x_btd.shape
    H = params["w_hh"].shape[1]
    O = params["w_out"].shape[0]
    Bp = _round_up(B, 8)      # sublane-dense batch
    Op = _round_up(O, 128)    # lane-dense classifier/output width

    # glue: layout transpose, batch padding, flatten to [T*Bp, D] for the
    # single hoisted input-projection matmul, weight pre-transpose, bias merge.
    x_tbd = jnp.transpose(x_btd, (1, 0, 2)).astype(jnp.float32)        # [T, B, D]
    x_tbd = jnp.pad(x_tbd, ((0, 0), (0, Bp - B), (0, 0)))              # [T, Bp, D]
    x_2d = x_tbd.reshape(T * Bp, D).astype(jnp.bfloat16)               # [T*Bp, D]

    len_p = jnp.pad(lengths.astype(jnp.int32), (0, Bp - B),
                    constant_values=1).reshape(Bp, 1)                  # [Bp, 1]

    w_ih_t = params["w_ih"].T.astype(jnp.bfloat16)                     # [D, 4H]
    w_hh_t = params["w_hh"].T.astype(jnp.bfloat16)                     # [H, 4H]
    b = (params["b_ih"] + params["b_hh"]).reshape(1, 4 * H).astype(jnp.float32)
    w_out_t = jnp.pad(params["w_out"].T.astype(jnp.float32),
                      ((0, 0), (0, Op - O))).astype(jnp.bfloat16)      # [H, Op]
    b_out = jnp.pad(params["b_out"].astype(jnp.float32), (0, Op - O),
                    constant_values=_NEG_BIG).reshape(1, Op)           # [1, Op]

    vmem = pl.BlockSpec(memory_space=pltpu.MemorySpace.VMEM)
    out_padded = pl.pallas_call(
        intent_lstm_kernel,
        out_shape=jax.ShapeDtypeStruct((Bp, Op), jnp.float32),
        in_specs=[vmem] * 7,
        out_specs=vmem,
        scratch_shapes=[pltpu.VMEM((T * Bp, 4 * H), jnp.float32)],
    )(x_2d, len_p, w_ih_t, w_hh_t, b, w_out_t, b_out)
    return out_padded[:B, :O]


def intent_cls_reference(x_btd, lengths, params):
    """Pure-f32 JAX reference (PyTorch semantics) for correctness checking."""
    B, T, D = x_btd.shape
    H = params["w_hh"].shape[1]
    w_ih_t = params["w_ih"].T
    w_hh_t = params["w_hh"].T
    b = params["b_ih"] + params["b_hh"]

    def step(carry, x_t):
        h, c = carry
        gates = x_t @ w_ih_t + h @ w_hh_t + b
        i_g = jax.nn.sigmoid(gates[:, 0 * H:1 * H])
        f_g = jax.nn.sigmoid(gates[:, 1 * H:2 * H])
        g_g = jnp.tanh(gates[:, 2 * H:3 * H])
        o_g = jax.nn.sigmoid(gates[:, 3 * H:4 * H])
        c_new = f_g * c + i_g * g_g
        h_new = o_g * jnp.tanh(c_new)
        return (h_new, c_new), h_new

    zeros = jnp.zeros((B, H), jnp.float32)
    _, hs = lax.scan(step, (zeros, zeros), jnp.transpose(x_btd, (1, 0, 2)))  # [T, B, H]
    hs = jnp.transpose(hs, (1, 0, 2))                                        # [B, T, H]
    last_h = hs[jnp.arange(B), lengths - 1]                                  # [B, H]
    logits = last_h @ params["w_out"].T + params["b_out"]
    return jax.nn.softmax(logits, axis=1)


if __name__ == "__main__":
    # small shapes consistent with the module's forward
    B, T = 2, 8           # batch_size, (padded) sequence length
    D = 16                # input_size
    H = 32                # hidden_size
    O = 8                 # output_size (number of intents)

    key = jax.random.PRNGKey(0)
    kx, k1, k2, k3, k4, k5, k6 = jax.random.split(key, 7)

    x = jax.random.normal(kx, (B, T, D), jnp.float32)
    lengths = jnp.array([T, T - 3], dtype=jnp.int32)

    # deterministic PyTorch-style init: U(-1/sqrt(H), 1/sqrt(H))
    bound = 1.0 / float(H) ** 0.5
    params = {
        "w_ih": jax.random.uniform(k1, (4 * H, D), jnp.float32, -bound, bound),
        "w_hh": jax.random.uniform(k2, (4 * H, H), jnp.float32, -bound, bound),
        "b_ih": jax.random.uniform(k3, (4 * H,), jnp.float32, -bound, bound),
        "b_hh": jax.random.uniform(k4, (4 * H,), jnp.float32, -bound, bound),
        "w_out": jax.random.uniform(k5, (O, H), jnp.float32, -bound, bound),
        "b_out": jax.random.uniform(k6, (O,), jnp.float32, -bound, bound),
    }

    out = jax.block_until_ready(intent_cls_forward(x, lengths, params))
    ref = jax.block_until_ready(intent_cls_reference(x, lengths, params))

    assert out.shape == (B, O)
    # tolerances account for bf16 MXU inputs + approx EUP reciprocal
    assert jnp.allclose(jnp.sum(out, axis=1), 1.0, atol=5e-3)
    assert jnp.allclose(out, ref, rtol=5e-3, atol=5e-3)

    print("KERNEL_OK")
</pallas_src>

<mosaic_0001>
module attributes {stable_mosaic.version = 11 : i64} {
  func.func @intent_lstm_kernel(%arg0: memref<64x16xbf16, #tpu.memory_space<vmem>>, %arg1: memref<8x1xi32, #tpu.memory_space<vmem>>, %arg2: memref<16x128xbf16, #tpu.memory_space<vmem>>, %arg3: memref<32x128xbf16, #tpu.memory_space<vmem>>, %arg4: memref<1x128xf32, #tpu.memory_space<vmem>>, %arg5: memref<32x128xbf16, #tpu.memory_space<vmem>>, %arg6: memref<1x128xf32, #tpu.memory_space<vmem>>, %arg7: memref<8x128xf32, #tpu.memory_space<vmem>>, %arg8: memref<64x128xf32, #tpu.memory_space<vmem>>) attributes {dimension_semantics = [], scalar_prefetch = 0 : i64, scratch_operands = 1 : i64, tpu.core_type = #tpu.core_type<tc>} {
    %c0 = arith.constant 0 : index
    %c0_0 = arith.constant 0 : index
    %0 = vector.load %arg0[%c0, %c0_0] : memref<64x16xbf16, #tpu.memory_space<vmem>>, vector<64x16xbf16>
    %c0_1 = arith.constant 0 : index
    %c0_2 = arith.constant 0 : index
    %1 = vector.load %arg2[%c0_1, %c0_2] : memref<16x128xbf16, #tpu.memory_space<vmem>>, vector<16x128xbf16>
    %cst = arith.constant dense<0.000000e+00> : vector<64x128xf32>
    %2 = tpu.matmul %0, %1, %cst {dimension_numbers = #tpu.dot_dimension_numbers<[1], [0], [0], [1], [0, 0, 1, 1], [], []>} : vector<64x16xbf16>, vector<16x128xbf16>, vector<64x128xf32> -> vector<64x128xf32>
    %c0_3 = arith.constant 0 : index
    %c0_4 = arith.constant 0 : index
    %3 = vector.load %arg4[%c0_3, %c0_4] : memref<1x128xf32, #tpu.memory_space<vmem>>, vector<1x128xf32>
    %4 = vector.broadcast %3 : vector<1x128xf32> to vector<64x128xf32>
    %5 = arith.addf %2, %4 : vector<64x128xf32>
    %c0_5 = arith.constant 0 : index
    %c0_6 = arith.constant 0 : index
    %6 = vector.load %arg8[%c0_5, %c0_6] : memref<64x128xf32, #tpu.memory_space<vmem>>, vector<64x128xf32>
    tpu.vector_store %arg8[%c0_5, %c0_6], %5 {strides = array<i32>} : memref<64x128xf32, #tpu.memory_space<vmem>>, vector<64x128xf32>,
    %c0_7 = arith.constant 0 : index
    %c0_8 = arith.constant 0 : index
    %7 = vector.load %arg3[%c0_7, %c0_8] : memref<32x128xbf16, #tpu.memory_space<vmem>>, vector<32x128xbf16>
    %c0_9 = arith.constant 0 : index
    %c0_10 = arith.constant 0 : index
    %8 = vector.load %arg1[%c0_9, %c0_10] : memref<8x1xi32, #tpu.memory_space<vmem>>, vector<8x1xi32>
    %c1_i32 = arith.constant 1 : i32
    %9 = vector.broadcast %c1_i32 : i32 to vector<8x1xi32>
    %10 = arith.subi %8, %9 : vector<8x1xi32>
    %11 = tpu.iota {dimensions = array<i32: 1>} : vector<8x128xi32>
    %c64_i32 = arith.constant 64 : i32
    %12 = vector.broadcast %c64_i32 : i32 to vector<8x128xi32>
    %13 = arith.cmpi sge, %11, %12 : vector<8x128xi32>
    %c96_i32 = arith.constant 96 : i32
    %14 = vector.broadcast %c96_i32 : i32 to vector<8x128xi32>
    %15 = arith.cmpi slt, %11, %14 : vector<8x128xi32>
    %16 = arith.andi %13, %15 : vector<8x128xi1>
    %cst_11 = arith.constant 0.000000e+00 : f32
    %17 = vector.broadcast %cst_11 : f32 to vector<8x32xf32>
    %c0_i32 = arith.constant 0 : i32
    %c8_i32 = arith.constant 8 : i32
    %18 = arith.muli %c0_i32, %c8_i32 : i32
    %19 = tpu.assume_multiple %18, 8 : i32
    %20 = arith.index_cast %19 : i32 to index
    %c0_12 = arith.constant 0 : index
    %21 = vector.load %arg8[%20, %c0_12] : memref<64x128xf32, #tpu.memory_space<vmem>>, vector<8x128xf32>
    %22 = arith.truncf %17 : vector<8x32xf32> to vector<8x32xbf16>
    %cst_13 = arith.constant dense<0.000000e+00> : vector<8x128xf32>
    %23 = tpu.matmul %22, %7, %cst_13 {dimension_numbers = #tpu.dot_dimension_numbers<[1], [0], [0], [1], [0, 0, 1, 1], [], []>} : vector<8x32xbf16>, vector<32x128xbf16>, vector<8x128xf32> -> vector<8x128xf32>
    %24 = arith.addf %21, %23 : vector<8x128xf32>
    %25 = math.tanh %24 : vector<8x128xf32>
    %26 = arith.negf %24 : vector<8x128xf32>
    %27 = math.exp %26 : vector<8x128xf32>
    %cst_14 = arith.constant 1.000000e+00 : f32
    %28 = vector.broadcast %cst_14 : f32 to vector<8x128xf32>
    %29 = arith.addf %28, %27 : vector<8x128xf32>
    %30 = arith.divf %28, %29 : vector<8x128xf32>
    %31 = arith.select %16, %25, %30 : vector<8x128xi1>, vector<8x128xf32>
    %32 = vector.extract_strided_slice %31 {offsets = [0, 0], sizes = [8, 32], strides = [1, 1]} : vector<8x128xf32> to vector<8x32xf32>
    %33 = vector.extract_strided_slice %31 {offsets = [0, 32], sizes = [8, 32], strides = [1, 1]} : vector<8x128xf32> to vector<8x32xf32>
    %34 = vector.extract_strided_slice %31 {offsets = [0, 64], sizes = [8, 32], strides = [1, 1]} : vector<8x128xf32> to vector<8x32xf32>
    %35 = vector.extract_strided_slice %31 {offsets = [0, 96], sizes = [8, 32], strides = [1, 1]} : vector<8x128xf32> to vector<8x32xf32>
    %36 = arith.mulf %33, %17 : vector<8x32xf32>
    %37 = arith.mulf %32, %34 : vector<8x32xf32>
    %38 = arith.addf %36, %37 : vector<8x32xf32>
    %39 = math.tanh %38 : vector<8x32xf32>
    %40 = arith.mulf %35, %39 : vector<8x32xf32>
    %41 = vector.broadcast %c0_i32 : i32 to vector<8x1xi32>
    %42 = arith.cmpi eq, %10, %41 : vector<8x1xi32>
    %43 = vector.shape_cast %42 : vector<8x1xi1> to vector<8x1xi1>
    %44 = vector.broadcast %43 : vector<8x1xi1> to vector<8x32xi1>
    %45 = arith.select %44, %40, %17 : vector<8x32xi1>, vector<8x32xf32>
    %c1_i32_15 = arith.constant 1 : i32
    %c8_i32_16 = arith.constant 8 : i32
    %46 = arith.muli %c1_i32_15, %c8_i32_16 : i32
    %47 = tpu.assume_multiple %46, 8 : i32
    %48 = arith.index_cast %47 : i32 to index
    %c0_17 = arith.constant 0 : index
    %49 = vector.load %arg8[%48, %c0_17] : memref<64x128xf32, #tpu.memory_space<vmem>>, vector<8x128xf32>
    %50 = arith.truncf %40 : vector<8x32xf32> to vector<8x32xbf16>
    %cst_18 = arith.constant dense<0.000000e+00> : vector<8x128xf32>
    %51 = tpu.matmul %50, %7, %cst_18 {dimension_numbers = #tpu.dot_dimension_numbers<[1], [0], [0], [1], [0, 0, 1, 1], [], []>} : vector<8x32xbf16>, vector<32x128xbf16>, vector<8x128xf32> -> vector<8x128xf32>
    %52 = arith.addf %49, %51 : vector<8x128xf32>
    %53 = math.tanh %52 : vector<8x128xf32>
    %54 = arith.negf %52 : vector<8x128xf32>
    %55 = math.exp %54 : vector<8x128xf32>
    %cst_19 = arith.constant 1.000000e+00 : f32
    %56 = vector.broadcast %cst_19 : f32 to vector<8x128xf32>
    %57 = arith.addf %56, %55 : vector<8x128xf32>
    %58 = arith.divf %56, %57 : vector<8x128xf32>
    %59 = arith.select %16, %53, %58 : vector<8x128xi1>, vector<8x128xf32>
    %60 = vector.extract_strided_slice %59 {offsets = [0, 0], sizes = [8, 32], strides = [1, 1]} : vector<8x128xf32> to vector<8x32xf32>
    %61 = vector.extract_strided_slice %59 {offsets = [0, 32], sizes = [8, 32], strides = [1, 1]} : vector<8x128xf32> to vector<8x32xf32>
    %62 = vector.extract_strided_slice %59 {offsets = [0, 64], sizes = [8, 32], strides = [1, 1]} : vector<8x128xf32> to vector<8x32xf32>
    %63 = vector.extract_strided_slice %59 {offsets = [0, 96], sizes = [8, 32], strides = [1, 1]} : vector<8x128xf32> to vector<8x32xf32>
    %64 = arith.mulf %61, %38 : vector<8x32xf32>
    %65 = arith.mulf %60, %62 : vector<8x32xf32>
    %66 = arith.addf %64, %65 : vector<8x32xf32>
    %67 = math.tanh %66 : vector<8x32xf32>
    %68 = arith.mulf %63, %67 : vector<8x32xf32>
    %69 = vector.broadcast %c1_i32_15 : i32 to vector<8x1xi32>
    %70 = arith.cmpi eq, %10, %69 : vector<8x1xi32>
    %71 = vector.shape_cast %70 : vector<8x1xi1> to vector<8x1xi1>
    %72 = vector.broadcast %71 : vector<8x1xi1> to vector<8x32xi1>
    %73 = arith.select %72, %68, %45 : vector<8x32xi1>, vector<8x32xf32>
    %c2_i32 = arith.constant 2 : i32
    %c8_i32_20 = arith.constant 8 : i32
    %74 = arith.muli %c2_i32, %c8_i32_20 : i32
    %75 = tpu.assume_multiple %74, 8 : i32
    %76 = arith.index_cast %75 : i32 to index
    %c0_21 = arith.constant 0 : index
    %77 = vector.load %arg8[%76, %c0_21] : memref<64x128xf32, #tpu.memory_space<vmem>>, vector<8x128xf32>
    %78 = arith.truncf %68 : vector<8x32xf32> to vector<8x32xbf16>
    %cst_22 = arith.constant dense<0.000000e+00> : vector<8x128xf32>
    %79 = tpu.matmul %78, %7, %cst_22 {dimension_numbers = #tpu.dot_dimension_numbers<[1], [0], [0], [1], [0, 0, 1, 1], [], []>} : vector<8x32xbf16>, vector<32x128xbf16>, vector<8x128xf32> -> vector<8x128xf32>
    %80 = arith.addf %77, %79 : vector<8x128xf32>
    %81 = math.tanh %80 : vector<8x128xf32>
    %82 = arith.negf %80 : vector<8x128xf32>
    %83 = math.exp %82 : vector<8x128xf32>
    %cst_23 = arith.constant 1.000000e+00 : f32
    %84 = vector.broadcast %cst_23 : f32 to vector<8x128xf32>
    %85 = arith.addf %84, %83 : vector<8x128xf32>
    %86 = arith.divf %84, %85 : vector<8x128xf32>
    %87 = arith.select %16, %81, %86 : vector<8x128xi1>, vector<8x128xf32>
    %88 = vector.extract_strided_slice %87 {offsets = [0, 0], sizes = [8, 32], strides = [1, 1]} : vector<8x128xf32> to vector<8x32xf32>
    %89 = vector.extract_strided_slice %87 {offsets = [0, 32], sizes = [8, 32], strides = [1, 1]} : vector<8x128xf32> to vector<8x32xf32>
    %90 = vector.extract_strided_slice %87 {offsets = [0, 64], sizes = [8, 32], strides = [1, 1]} : vector<8x128xf32> to vector<8x32xf32>
    %91 = vector.extract_strided_slice %87 {offsets = [0, 96], sizes = [8, 32], strides = [1, 1]} : vector<8x128xf32> to vector<8x32xf32>
    %92 = arith.mulf %89, %66 : vector<8x32xf32>
    %93 = arith.mulf %88, %90 : vector<8x32xf32>
    %94 = arith.addf %92, %93 : vector<8x32xf32>
    %95 = math.tanh %94 : vector<8x32xf32>
    %96 = arith.mulf %91, %95 : vector<8x32xf32>
    %97 = vector.broadcast %c2_i32 : i32 to vector<8x1xi32>
    %98 = arith.cmpi eq, %10, %97 : vector<8x1xi32>
    %99 = vector.shape_cast %98 : vector<8x1xi1> to vector<8x1xi1>
    %100 = vector.broadcast %99 : vector<8x1xi1> to vector<8x32xi1>
    %101 = arith.select %100, %96, %73 : vector<8x32xi1>, vector<8x32xf32>
    %c3_i32 = arith.constant 3 : i32
    %c8_i32_24 = arith.constant 8 : i32
    %102 = arith.muli %c3_i32, %c8_i32_24 : i32
    %103 = tpu.assume_multiple %102, 8 : i32
    %104 = arith.index_cast %103 : i32 to index
    %c0_25 = arith.constant 0 : index
    %105 = vector.load %arg8[%104, %c0_25] : memref<64x128xf32, #tpu.memory_space<vmem>>, vector<8x128xf32>
    %106 = arith.truncf %96 : vector<8x32xf32> to vector<8x32xbf16>
    %cst_26 = arith.constant dense<0.000000e+00> : vector<8x128xf32>
    %107 = tpu.matmul %106, %7, %cst_26 {dimension_numbers = #tpu.dot_dimension_numbers<[1], [0], [0], [1], [0, 0, 1, 1], [], []>} : vector<8x32xbf16>, vector<32x128xbf16>, vector<8x128xf32> -> vector<8x128xf32>
    %108 = arith.addf %105, %107 : vector<8x128xf32>
    %109 = math.tanh %108 : vector<8x128xf32>
    %110 = arith.negf %108 : vector<8x128xf32>
    %111 = math.exp %110 : vector<8x128xf32>
    %cst_27 = arith.constant 1.000000e+00 : f32
    %112 = vector.broadcast %cst_27 : f32 to vector<8x128xf32>
    %113 = arith.addf %112, %111 : vector<8x128xf32>
    %114 = arith.divf %112, %113 : vector<8x128xf32>
    %115 = arith.select %16, %109, %114 : vector<8x128xi1>, vector<8x128xf32>
    %116 = vector.extract_strided_slice %115 {offsets = [0, 0], sizes = [8, 32], strides = [1, 1]} : vector<8x128xf32> to vector<8x32xf32>
    %117 = vector.extract_strided_slice %115 {offsets = [0, 32], sizes = [8, 32], strides = [1, 1]} : vector<8x128xf32> to vector<8x32xf32>
    %118 = vector.extract_strided_slice %115 {offsets = [0, 64], sizes = [8, 32], strides = [1, 1]} : vector<8x128xf32> to vector<8x32xf32>
    %119 = vector.extract_strided_slice %115 {offsets = [0, 96], sizes = [8, 32], strides = [1, 1]} : vector<8x128xf32> to vector<8x32xf32>
    %120 = arith.mulf %117, %94 : vector<8x32xf32>
    %121 = arith.mulf %116, %118 : vector<8x32xf32>
    %122 = arith.addf %120, %121 : vector<8x32xf32>
    %123 = math.tanh %122 : vector<8x32xf32>
    %124 = arith.mulf %119, %123 : vector<8x32xf32>
    %125 = vector.broadcast %c3_i32 : i32 to vector<8x1xi32>
    %126 = arith.cmpi eq, %10, %125 : vector<8x1xi32>
    %127 = vector.shape_cast %126 : vector<8x1xi1> to vector<8x1xi1>
    %128 = vector.broadcast %127 : vector<8x1xi1> to vector<8x32xi1>
    %129 = arith.select %128, %124, %101 : vector<8x32xi1>, vector<8x32xf32>
    %c4_i32 = arith.constant 4 : i32
    %c8_i32_28 = arith.constant 8 : i32
    %130 = arith.muli %c4_i32, %c8_i32_28 : i32
    %131 = tpu.assume_multiple %130, 8 : i32
    %132 = arith.index_cast %131 : i32 to index
    %c0_29 = arith.constant 0 : index
    %133 = vector.load %arg8[%132, %c0_29] : memref<64x128xf32, #tpu.memory_space<vmem>>, vector<8x128xf32>
    %134 = arith.truncf %124 : vector<8x32xf32> to vector<8x32xbf16>
    %cst_30 = arith.constant dense<0.000000e+00> : vector<8x128xf32>
    %135 = tpu.matmul %134, %7, %cst_30 {dimension_numbers = #tpu.dot_dimension_numbers<[1], [0], [0], [1], [0, 0, 1, 1], [], []>} : vector<8x32xbf16>, vector<32x128xbf16>, vector<8x128xf32> -> vector<8x128xf32>
    %136 = arith.addf %133, %135 : vector<8x128xf32>
    %137 = math.tanh %136 : vector<8x128xf32>
    %138 = arith.negf %136 : vector<8x128xf32>
    %139 = math.exp %138 : vector<8x128xf32>
    %cst_31 = arith.constant 1.000000e+00 : f32
    %140 = vector.broadcast %cst_31 : f32 to vector<8x128xf32>
    %141 = arith.addf %140, %139 : vector<8x128xf32>
    %142 = arith.divf %140, %141 : vector<8x128xf32>
    %143 = arith.select %16, %137, %142 : vector<8x128xi1>, vector<8x128xf32>
    %144 = vector.extract_strided_slice %143 {offsets = [0, 0], sizes = [8, 32], strides = [1, 1]} : vector<8x128xf32> to vector<8x32xf32>
    %145 = vector.extract_strided_slice %143 {offsets = [0, 32], sizes = [8, 32], strides = [1, 1]} : vector<8x128xf32> to vector<8x32xf32>
    %146 = vector.extract_strided_slice %143 {offsets = [0, 64], sizes = [8, 32], strides = [1, 1]} : vector<8x128xf32> to vector<8x32xf32>
    %147 = vector.extract_strided_slice %143 {offsets = [0, 96], sizes = [8, 32], strides = [1, 1]} : vector<8x128xf32> to vector<8x32xf32>
    %148 = arith.mulf %145, %122 : vector<8x32xf32>
    %149 = arith.mulf %144, %146 : vector<8x32xf32>
    %150 = arith.addf %148, %149 : vector<8x32xf32>
    %151 = math.tanh %150 : vector<8x32xf32>
    %152 = arith.mulf %147, %151 : vector<8x32xf32>
    %153 = vector.broadcast %c4_i32 : i32 to vector<8x1xi32>
    %154 = arith.cmpi eq, %10, %153 : vector<8x1xi32>
    %155 = vector.shape_cast %154 : vector<8x1xi1> to vector<8x1xi1>
    %156 = vector.broadcast %155 : vector<8x1xi1> to vector<8x32xi1>
    %157 = arith.select %156, %152, %129 : vector<8x32xi1>, vector<8x32xf32>
    %c5_i32 = arith.constant 5 : i32
    %c8_i32_32 = arith.constant 8 : i32
    %158 = arith.muli %c5_i32, %c8_i32_32 : i32
    %159 = tpu.assume_multiple %158, 8 : i32
    %160 = arith.index_cast %159 : i32 to index
    %c0_33 = arith.constant 0 : index
    %161 = vector.load %arg8[%160, %c0_33] : memref<64x128xf32, #tpu.memory_space<vmem>>, vector<8x128xf32>
    %162 = arith.truncf %152 : vector<8x32xf32> to vector<8x32xbf16>
    %cst_34 = arith.constant dense<0.000000e+00> : vector<8x128xf32>
    %163 = tpu.matmul %162, %7, %cst_34 {dimension_numbers = #tpu.dot_dimension_numbers<[1], [0], [0], [1], [0, 0, 1, 1], [], []>} : vector<8x32xbf16>, vector<32x128xbf16>, vector<8x128xf32> -> vector<8x128xf32>
    %164 = arith.addf %161, %163 : vector<8x128xf32>
    %165 = math.tanh %164 : vector<8x128xf32>
    %166 = arith.negf %164 : vector<8x128xf32>
    %167 = math.exp %166 : vector<8x128xf32>
    %cst_35 = arith.constant 1.000000e+00 : f32
    %168 = vector.broadcast %cst_35 : f32 to vector<8x128xf32>
    %169 = arith.addf %168, %167 : vector<8x128xf32>
    %170 = arith.divf %168, %169 : vector<8x128xf32>
    %171 = arith.select %16, %165, %170 : vector<8x128xi1>, vector<8x128xf32>
    %172 = vector.extract_strided_slice %171 {offsets = [0, 0], sizes = [8, 32], strides = [1, 1]} : vector<8x128xf32> to vector<8x32xf32>
    %173 = vector.extract_strided_slice %171 {offsets = [0, 32], sizes = [8, 32], strides = [1, 1]} : vector<8x128xf32> to vector<8x32xf32>
    %174 = vector.extract_strided_slice %171 {offsets = [0, 64], sizes = [8, 32], strides = [1, 1]} : vector<8x128xf32> to vector<8x32xf32>
    %175 = vector.extract_strided_slice %171 {offsets = [0, 96], sizes = [8, 32], strides = [1, 1]} : vector<8x128xf32> to vector<8x32xf32>
    %176 = arith.mulf %173, %150 : vector<8x32xf32>
    %177 = arith.mulf %172, %174 : vector<8x32xf32>
    %178 = arith.addf %176, %177 : vector<8x32xf32>
    %179 = math.tanh %178 : vector<8x32xf32>
    %180 = arith.mulf %175, %179 : vector<8x32xf32>
    %181 = vector.broadcast %c5_i32 : i32 to vector<8x1xi32>
    %182 = arith.cmpi eq, %10, %181 : vector<8x1xi32>
    %183 = vector.shape_cast %182 : vector<8x1xi1> to vector<8x1xi1>
    %184 = vector.broadcast %183 : vector<8x1xi1> to vector<8x32xi1>
    %185 = arith.select %184, %180, %157 : vector<8x32xi1>, vector<8x32xf32>
    %c6_i32 = arith.constant 6 : i32
    %c8_i32_36 = arith.constant 8 : i32
    %186 = arith.muli %c6_i32, %c8_i32_36 : i32
    %187 = tpu.assume_multiple %186, 8 : i32
    %188 = arith.index_cast %187 : i32 to index
    %c0_37 = arith.constant 0 : index
    %189 = vector.load %arg8[%188, %c0_37] : memref<64x128xf32, #tpu.memory_space<vmem>>, vector<8x128xf32>
    %190 = arith.truncf %180 : vector<8x32xf32> to vector<8x32xbf16>
    %cst_38 = arith.constant dense<0.000000e+00> : vector<8x128xf32>
    %191 = tpu.matmul %190, %7, %cst_38 {dimension_numbers = #tpu.dot_dimension_numbers<[1], [0], [0], [1], [0, 0, 1, 1], [], []>} : vector<8x32xbf16>, vector<32x128xbf16>, vector<8x128xf32> -> vector<8x128xf32>
    %192 = arith.addf %189, %191 : vector<8x128xf32>
    %193 = math.tanh %192 : vector<8x128xf32>
    %194 = arith.negf %192 : vector<8x128xf32>
    %195 = math.exp %194 : vector<8x128xf32>
    %cst_39 = arith.constant 1.000000e+00 : f32
    %196 = vector.broadcast %cst_39 : f32 to vector<8x128xf32>
    %197 = arith.addf %196, %195 : vector<8x128xf32>
    %198 = arith.divf %196, %197 : vector<8x128xf32>
    %199 = arith.select %16, %193, %198 : vector<8x128xi1>, vector<8x128xf32>
    %200 = vector.extract_strided_slice %199 {offsets = [0, 0], sizes = [8, 32], strides = [1, 1]} : vector<8x128xf32> to vector<8x32xf32>
    %201 = vector.extract_strided_slice %199 {offsets = [0, 32], sizes = [8, 32], strides = [1, 1]} : vector<8x128xf32> to vector<8x32xf32>
    %202 = vector.extract_strided_slice %199 {offsets = [0, 64], sizes = [8, 32], strides = [1, 1]} : vector<8x128xf32> to vector<8x32xf32>
    %203 = vector.extract_strided_slice %199 {offsets = [0, 96], sizes = [8, 32], strides = [1, 1]} : vector<8x128xf32> to vector<8x32xf32>
    %204 = arith.mulf %201, %178 : vector<8x32xf32>
    %205 = arith.mulf %200, %202 : vector<8x32xf32>
    %206 = arith.addf %204, %205 : vector<8x32xf32>
    %207 = math.tanh %206 : vector<8x32xf32>
    %208 = arith.mulf %203, %207 : vector<8x32xf32>
    %209 = vector.broadcast %c6_i32 : i32 to vector<8x1xi32>
    %210 = arith.cmpi eq, %10, %209 : vector<8x1xi32>
    %211 = vector.shape_cast %210 : vector<8x1xi1> to vector<8x1xi1>
    %212 = vector.broadcast %211 : vector<8x1xi1> to vector<8x32xi1>
    %213 = arith.select %212, %208, %185 : vector<8x32xi1>, vector<8x32xf32>
    %c7_i32 = arith.constant 7 : i32
    %c8_i32_40 = arith.constant 8 : i32
    %214 = arith.muli %c7_i32, %c8_i32_40 : i32
    %215 = tpu.assume_multiple %214, 8 : i32
    %216 = arith.index_cast %215 : i32 to index
    %c0_41 = arith.constant 0 : index
    %217 = vector.load %arg8[%216, %c0_41] : memref<64x128xf32, #tpu.memory_space<vmem>>, vector<8x128xf32>
    %218 = arith.truncf %208 : vector<8x32xf32> to vector<8x32xbf16>
    %cst_42 = arith.constant dense<0.000000e+00> : vector<8x128xf32>
    %219 = tpu.matmul %218, %7, %cst_42 {dimension_numbers = #tpu.dot_dimension_numbers<[1], [0], [0], [1], [0, 0, 1, 1], [], []>} : vector<8x32xbf16>, vector<32x128xbf16>, vector<8x128xf32> -> vector<8x128xf32>
    %220 = arith.addf %217, %219 : vector<8x128xf32>
    %221 = math.tanh %220 : vector<8x128xf32>
    %222 = arith.negf %220 : vector<8x128xf32>
    %223 = math.exp %222 : vector<8x128xf32>
    %cst_43 = arith.constant 1.000000e+00 : f32
    %224 = vector.broadcast %cst_43 : f32 to vector<8x128xf32>
    %225 = arith.addf %224, %223 : vector<8x128xf32>
    %226 = arith.divf %224, %225 : vector<8x128xf32>
    %227 = arith.select %16, %221, %226 : vector<8x128xi1>, vector<8x128xf32>
    %228 = vector.extract_strided_slice %227 {offsets = [0, 0], sizes = [8, 32], strides = [1, 1]} : vector<8x128xf32> to vector<8x32xf32>
    %229 = vector.extract_strided_slice %227 {offsets = [0, 32], sizes = [8, 32], strides = [1, 1]} : vector<8x128xf32> to vector<8x32xf32>
    %230 = vector.extract_strided_slice %227 {offsets = [0, 64], sizes = [8, 32], strides = [1, 1]} : vector<8x128xf32> to vector<8x32xf32>
    %231 = vector.extract_strided_slice %227 {offsets = [0, 96], sizes = [8, 32], strides = [1, 1]} : vector<8x128xf32> to vector<8x32xf32>
    %232 = arith.mulf %229, %206 : vector<8x32xf32>
    %233 = arith.mulf %228, %230 : vector<8x32xf32>
    %234 = arith.addf %232, %233 : vector<8x32xf32>
    %235 = math.tanh %234 : vector<8x32xf32>
    %236 = arith.mulf %231, %235 : vector<8x32xf32>
    %237 = vector.broadcast %c7_i32 : i32 to vector<8x1xi32>
    %238 = arith.cmpi eq, %10, %237 : vector<8x1xi32>
    %239 = vector.shape_cast %238 : vector<8x1xi1> to vector<8x1xi1>
    %240 = vector.broadcast %239 : vector<8x1xi1> to vector<8x32xi1>
    %241 = arith.select %240, %236, %213 : vector<8x32xi1>, vector<8x32xf32>
    %c8_i32_44 = arith.constant 8 : i32
    %242 = arith.truncf %241 : vector<8x32xf32> to vector<8x32xbf16>
    %c0_45 = arith.constant 0 : index
    %c0_46 = arith.constant 0 : index
    %243 = vector.load %arg5[%c0_45, %c0_46] : memref<32x128xbf16, #tpu.memory_space<vmem>>, vector<32x128xbf16>
    %cst_47 = arith.constant dense<0.000000e+00> : vector<8x128xf32>
    %244 = tpu.matmul %242, %243, %cst_47 {dimension_numbers = #tpu.dot_dimension_numbers<[1], [0], [0], [1], [0, 0, 1, 1], [], []>} : vector<8x32xbf16>, vector<32x128xbf16>, vector<8x128xf32> -> vector<8x128xf32>
    %c0_48 = arith.constant 0 : index
    %c0_49 = arith.constant 0 : index
    %245 = vector.load %arg6[%c0_48, %c0_49] : memref<1x128xf32, #tpu.memory_space<vmem>>, vector<1x128xf32>
    %246 = vector.broadcast %245 : vector<1x128xf32> to vector<8x128xf32>
    %247 = arith.addf %244, %246 : vector<8x128xf32>
    %cst_50 = arith.constant dense<0xFF800000> : vector<8xf32>
    %248 = vector.multi_reduction <maximumf>, %247, %cst_50 [1] : vector<8x128xf32> to vector<8xf32>
    %249 = vector.shape_cast %248 : vector<8xf32> to vector<8x1xf32>
    %250 = vector.broadcast %249 : vector<8x1xf32> to vector<8x128xf32>
    %251 = arith.subf %247, %250 : vector<8x128xf32>
    %252 = math.exp %251 : vector<8x128xf32>
    %cst_51 = arith.constant dense<0.000000e+00> : vector<8xf32>
    %253 = vector.multi_reduction <add>, %252, %cst_51 [1] : vector<8x128xf32> to vector<8xf32>
    %254 = vector.shape_cast %253 : vector<8xf32> to vector<8x1xf32>
    %255 = tpu.reciprocal %254 {approx = true} : vector<8x1xf32> -> vector<8x1xf32>
    %256 = vector.broadcast %255 : vector<8x1xf32> to vector<8x128xf32>
    %257 = arith.mulf %252, %256 : vector<8x128xf32>
    %c0_52 = arith.constant 0 : index
    %c0_53 = arith.constant 0 : index
    %258 = vector.load %arg7[%c0_52, %c0_53] : memref<8x128xf32, #tpu.memory_space<vmem>>, vector<8x128xf32>
    tpu.vector_store %arg7[%c0_52, %c0_53], %257 {strides = array<i32>} : memref<8x128xf32, #tpu.memory_space<vmem>>, vector<8x128xf32>,
    return
  }
}

</mosaic_0001>

<bundles_post_ra>
// kernel: tpu_custom_call.1
= control target key start
LH: loop header
LB: loop body
LE: loop exit
PB: predicated region body
PF: predicated region fallthrough
CT: control target
= control target key end

     0   :  { %v1181_v1 = vmov 0.0   ;;  %vm71_vm0 = vcmask 130048   ;;  %vm1182_vm1 = vmmov 0   ;;  %v1183_v6 = vmov 0   ;;  %s1469_s0 = inlined_call_operand.vmem [shape: bf16[64,16], index: 0, kind: input, shape index: {}]   ;;  %s1470_s1 = inlined_call_operand.vmem [shape: s32[8,1], index: 1, kind: input, shape index: {}]   ;;  %s1471_s2 = inlined_call_operand.vmem [shape: bf16[16,128], index: 2, kind: input, shape index: {}]   ;;  %s1472_s3 = inlined_call_operand.vmem [shape: bf16[32,128], index: 3, kind: input, shape index: {}]   ;;  %s1473_s4 = inlined_call_operand.vmem [shape: f32[1,128], index: 4, kind: input, shape index: {}]   ;;  %s1474_s5 = inlined_call_operand.vmem [shape: bf16[32,128], index: 5, kind: input, shape index: {}]   ;;  %s1475_s6 = inlined_call_operand.vmem [shape: f32[1,128], index: 6, kind: input, shape index: {}]   ;;  %s1476_s7 = inlined_call_operand.hbm [shape: f32[8,128], index: 7, kind: output, shape index: {}]  }
   0x1   :  { %v1080_v0 = vld [vmem:[%s1471_s2] sm:$0xff]   ;;  %1000 = vmatprep.subr.bf16.mxu1 %v1181_v1  ;;  %v1083_v4 = vld [vmem:[%s1469_s0 + $0x8] sm:$0xff]   ;;  %1004 = vmatprep.mubr.msk.bf16.mxu1 %vm1182_vm1, %v1181_v1 }
   0x2   :  { %v1234_v2 = vld [vmem:[%s1472_s3] sm:$0xff]   ;;  %990 = vmatprep.subr.bf16.mxu0 %v1080_v0  ;;  %v1248_v5 = vld [vmem:[%s1472_s3 + $0x8] sm:$0xff]   ;;  %1078 = vset.pattern.permute.xlu0 %v1183_v6 }
   0x3   :  { %v1082_v3 = vld [vmem:[%s1469_s0] sm:$0xff]   ;;  %1001 = vmatpush3.bf16.msra.mxu1 %v1234_v2  ;;  %991 = vmatpush3.bf16.msra.mxu0 %v1080_v0 }
   0x4   :  { %992 = vmatprep.mubr.msk.bf16.mxu0 %vm71_vm0, %v1082_v3  ;;  %1002 = vmatprep.subr.bf16.mxu1 %v1181_v1 }
   0x5   :  { %1016 = vmatprep.subr.bf16.mxu0 %v1181_v1 }
   0x6   :  { %993 = vmatmul.mubr.msk.bf16.vlgmr.msra.gmra.mrb[0].mxu0 %vm71_vm0, %v1083_v4 }
   0x7   :  { %1003 = vmatpush3.bf16.msra.mxu1 %v1248_v5  ;;  %1017 = vmatpush3.bf16.msra.mxu0 %v1234_v2 }
   0x8   :  { %12 = vsyncpa [#allocation4], 0  ;;  %1008 = vmatprep.subr.bf16.mxu1 %v1181_v1  ;;  %1018 = vmatprep.subr.bf16.mxu0 %v1181_v1  ;;  %v1272_v7 = vld [vmem:[%s1473_s4] ss:$0 sm:$0xff]  ;;  %v163_v20 = vlaneseq  ;;  %s1184_s4 = smov 64   ;;  %s1185_s11 = smov 32  }
   0x9   :  { %1079 = vset.pattern.permute.xlu1 %v1183_v6  ;;  %vm181_vm5 = vcmask 261120   ;;  %v1085_v54 = vld [vmem:[%s1469_s0 + $0x10] sm:$0xff]   ;;  %v1086_v55 = vld [vmem:[%s1469_s0 + $0x18] sm:$0xff]   ;;  %s1186_s21 = smov [#allocation3]  }
   0xa   :  { %1005 = vmatmul.mubr.bf16.vlgmr.msra.gmra.mrb[0].mxu1 %v1183_v6  ;;  %v164_v22 = vand.u32 127, %v163_v20  ;;  %996 = vmatprep.mubr.msk.bf16.mxu0 %vm71_vm0, %v1085_v54  ;;  %s918_s22 = sshll.u32 %s1186_s21, 4  ;;  %s919_s22 = int_to_ptr.vmem [resolvable:$true] %s918_s22 }
   0xb   :  { %1009 = vmatpush3.bf16.msra.mxu1 %v1234_v2  ;;  %1012 = vmatprep.mubr.msk.bf16.mxu1 %vm1182_vm1, %v1181_v1  ;;  %p1162_p1 = scmp.lt.s32.totalorder %s919_s22, %s919_s22 }
   0xc   :  { %1010 = vmatprep.subr.bf16.mxu1 %v1181_v1  ;;  %1019 = vmatpush3.bf16.msra.mxu0 %v1248_v5  ;;  %vm165_vm2 = vcmp.ge.s32.totalorder %v164_v22, 64  ;;  %vm166_vm3 = vcmp.lt.s32.totalorder %v164_v22, 96 }
   0xd   :  { %1032 = vmatprep.subr.bf16.mxu0 %v1181_v1  ;;  %vm1279_vm4 = vmand %vm165_vm2, %vm166_vm3 }
   0xe   :  { %997 = vmatmul.mubr.msk.bf16.gmra.mrb[4].mxu0 %vm71_vm0, %v1086_v55 }
   0xf   :  { %1011 = vmatpush3.bf16.msra.mxu1 %v1248_v5  ;;  %1020 = vmatprep.mubr.msk.bf16.mxu0 %vm1182_vm1, %v1181_v1 }
  0x10   :  { %1024 = vmatprep.subr.bf16.mxu1 %v1181_v1 }
  0xd9   :  { %v1274_v8 = vpop.f32.mrb[0].mxu0 }
  0xda   :  { %v118_v9 = vpop.f32.mrb[1].mxu0  ;;  %v127_v3 = vadd.f32 %v1274_v8, %v1272_v7 }
  0xdb   :  { %v119_v10 = vadd.f32 %v1272_v7, %v118_v9  ;;  %v1277_v11 = vpop.f32.mrb[2].mxu0 }
  0xdc   :  { %v121_v12 = vpop.f32.mrb[3].mxu0 }
  0xdd   :  { %v219_v13 = vpop.f32.mrb[0].mxu1  ;;  %v122_v37 = vadd.f32 %v1272_v7, %v121_v12 }
  0xde   :  { %v225_v14 = vadd.f32 %v219_v13, %v119_v10  ;;  %v1006_v15 = vpop.f32.mrb[1].mxu1 }
  0xdf   :  { %v222_v16 = vpop.f32.mrb[2].mxu1 }
  0xe0   :  { %v939_v17 = vmul.f32 -1.442695, %v225_v14  ;;  %v1007_v18 = vpop.f32.mrb[3].mxu1 }
  0xe1   :  { %v1321_v60 = vpop.f32.mrb[4].mxu0 }
  0xe2   :  { %1089 = vpow2.f32 %v939_v17  ;;  %v1323_v61 = vpop.f32.mrb[5].mxu0 }
  0xe3   :  { %1091 = vtanh.f32 %v225_v14  ;;  %v1325_v62 = vpop.f32.mrb[6].mxu0 }
  0xe4   :  { %v1327_v63 = vpop.f32.mrb[7].mxu0 }
  0xec   :  { %v1090_v19 = vpop.eup %1089 }
  0xed   :  { %v230_v21 = vadd.f32 1.0, %v1090_v19  ;;  %v1092_v24 = vpop.eup %1091 }
  0xef   :  { %1093 = vrcp.f32 %v230_v21 }
  0xf9   :  { %v1094_v25 = vpop.eup %1093 }
  0xfa   :  { %v233_v26 = vsel %vm1279_vm4, %v1092_v24, %v1094_v25 }
  0xfb   :  { %236 = vrot.lane.b32.xlu0 %v233_v26, %s1184_s4  ;;  %v234_v29 = vmul.f32 0.0, %v233_v26 }
 0x16d   :  { %v237_v27 = vpop.permute.xlu0 %236 }
 0x16e   :  { %v239_v28 = vmul.f32 %v237_v27, %v233_v26 }
 0x170   :  { %241 = vrot.lane.b32.xlu0 %v239_v28, %s1185_s11 }
 0x1e2   :  { %v242_v30 = vpop.permute.xlu0 %241 }
 0x1e3   :  { %v244_v31 = vadd.f32 %v242_v30, %v234_v29  ;;  %v130_v30 = vadd.f32 %v1277_v11, %v1272_v7 }
 0x1e5   :  { %1095 = vtanh.f32 %v244_v31 }
 0x1ef   :  { %v1096_v32 = vpop.eup %1095 }
 0x1f0   :  { %247 = vrot.lane.b32.xlu1 %v1096_v32, %s1184_s4 }
 0x262   :  { %v248_v33 = vpop.permute.xlu1 %247 }
 0x263   :  { %v1288_v34 = vmul.f32 %v248_v33, %v233_v26 }
 0x265   :  { %v260_v35 = vpack.c.bf16 %v1288_v34, %v1288_v34 }
 0x267   :  { %262 = vrot.lane.b32.xlu1 %v260_v35, %s1185_s11 }
 0x2d9   :  { %v263_v36 = vpop.permute.xlu1 %262 }
 0x2da   :  { %1013 = vmatmul.mubr.msk.bf16.vlgmr.msra.gmra.mrb[4].mxu1 %vm181_vm5, %v263_v36 }
 0x2db   :  { %1025 = vmatpush3.bf16.msra.mxu1 %v1234_v2  ;;  %1028 = vmatprep.mubr.msk.bf16.mxu1 %vm1182_vm1, %v1181_v1 }
 0x2dc   :  { %1026 = vmatprep.subr.bf16.mxu1 %v1181_v1 }
 0x2df   :  { %1027 = vmatpush3.bf16.msra.mxu1 %v1248_v5 }
 0x2e0   :  { %1040 = vmatprep.subr.bf16.mxu1 %v1181_v1 }
 0x3ad   :  { %v301_v38 = vpop.f32.mrb[4].mxu1 }
 0x3ae   :  { %v307_v39 = vadd.f32 %v301_v38, %v122_v37  ;;  %v1014_v40 = vpop.f32.mrb[5].mxu1 }
 0x3af   :  { %v304_v41 = vpop.f32.mrb[6].mxu1 }
 0x3b0   :  { %v941_v42 = vmul.f32 -1.442695, %v307_v39  ;;  %v1015_v43 = vpop.f32.mrb[7].mxu1 }
 0x3b2   :  { %1097 = vpow2.f32 %v941_v42 }
 0x3b3   :  { %1099 = vtanh.f32 %v307_v39 }
 0x3bc   :  { %v1098_v44 = vpop.eup %1097 }
 0x3bd   :  { %v312_v45 = vadd.f32 1.0, %v1098_v44  ;;  %v1100_v46 = vpop.eup %1099 }
 0x3bf   :  { %1101 = vrcp.f32 %v312_v45 }
 0x3c9   :  { %v1102_v47 = vpop.eup %1101 }
 0x3ca   :  { %v315_v48 = vsel %vm1279_vm4, %v1100_v46, %v1102_v47 }
 0x3cb   :  { %318 = vrot.lane.b32.xlu0 %v315_v48, %s1184_s4  ;;  %v316_v51 = vmul.f32 %v315_v48, %v244_v31 }
 0x43d   :  { %v319_v49 = vpop.permute.xlu0 %318 }
 0x43e   :  { %v321_v50 = vmul.f32 %v319_v49, %v315_v48 }
 0x440   :  { %323 = vrot.lane.b32.xlu1 %v321_v50, %s1185_s11 }
 0x4b2   :  { %v324_v52 = vpop.permute.xlu1 %323 }
 0x4b3   :  { %v326_v53 = vadd.f32 %v324_v52, %v316_v51  ;;  %v135_v52 = vadd.f32 %v1272_v7, %v1323_v61 }
 0x4b5   :  { %1103 = vtanh.f32 %v326_v53 }
 0x4bf   :  { %v1104_v56 = vpop.eup %1103 }
 0x4c0   :  { %329 = vrot.lane.b32.xlu0 %v1104_v56, %s1184_s4 }
 0x532   :  { %v330_v57 = vpop.permute.xlu0 %329 }
 0x533   :  { %v1316_v58 = vmul.f32 %v330_v57, %v315_v48 }
 0x535   :  { %v342_v59 = vpack.c.bf16 %v1316_v58, %v1316_v58 }
 0x537   :  { %344 = vrot.lane.b32.xlu1 %v342_v59, %s1185_s11 }
 0x5a9   :  { %v345_v0 = vpop.permute.xlu1 %344 }
 0x5aa   :  { %1021 = vmatmul.mubr.msk.bf16.vlgmr.msra.gmra.mrb[8].mxu0 %vm181_vm5, %v345_v0 }
 0x5ab   :  { %1033 = vmatpush3.bf16.msra.mxu0 %v1234_v2  ;;  %1036 = vmatprep.mubr.msk.bf16.mxu0 %vm1182_vm1, %v1181_v1 }
 0x5ac   :  { %1034 = vmatprep.subr.bf16.mxu0 %v1181_v1 }
 0x5af   :  { %1035 = vmatpush3.bf16.msra.mxu0 %v1248_v5 }
 0x5b0   :  { %1048 = vmatprep.subr.bf16.mxu0 %v1181_v1 }
 0x67d   :  { %v383_v4 = vpop.f32.mrb[8].mxu0 }
 0x67e   :  { %v389_v9 = vadd.f32 %v383_v4, %v127_v3  ;;  %v1022_v10 = vpop.f32.mrb[9].mxu0 }
 0x67f   :  { %v386_v12 = vpop.f32.mrb[10].mxu0 }
 0x680   :  { %v943_v13 = vmul.f32 -1.442695, %v389_v9  ;;  %v1023_v14 = vpop.f32.mrb[11].mxu0 }
 0x682   :  { %1105 = vpow2.f32 %v943_v13 }
 0x683   :  { %1107 = vtanh.f32 %v389_v9 }
 0x68c   :  { %v1106_v15 = vpop.eup %1105 }
 0x68d   :  { %v394_v16 = vadd.f32 1.0, %v1106_v15  ;;  %v1108_v17 = vpop.eup %1107 }
 0x68f   :  { %1109 = vrcp.f32 %v394_v16 }
 0x699   :  { %v1110_v18 = vpop.eup %1109 }
 0x69a   :  { %v397_v19 = vsel %vm1279_vm4, %v1108_v17, %v1110_v18 }
 0x69b   :  { %400 = vrot.lane.b32.xlu0 %v397_v19, %s1184_s4  ;;  %v398_v21 = vmul.f32 %v397_v19, %v326_v53 }
 0x70d   :  { %v401_v20 = vpop.permute.xlu0 %400 }
 0x70e   :  { %v403_v8 = vmul.f32 %v401_v20, %v397_v19 }
 0x710   :  { %405 = vrot.lane.b32.xlu1 %v403_v8, %s1185_s11  ;;  %v138_v8 = vadd.f32 %v1272_v7, %v1327_v63 }
 0x782   :  { %v406_v22 = vpop.permute.xlu1 %405 }
 0x783   :  { %v408_v24 = vadd.f32 %v406_v22, %v398_v21 }
 0x785   :  { %1111 = vtanh.f32 %v408_v24 }
 0x78f   :  { %v1112_v25 = vpop.eup %1111 }
 0x790   :  { %411 = vrot.lane.b32.xlu0 %v1112_v25, %s1184_s4 }
 0x802   :  { %v412_v26 = vpop.permute.xlu0 %411 }
 0x803   :  { %v1343_v27 = vmul.f32 %v412_v26, %v397_v19 }
 0x805   :  { %v424_v28 = vpack.c.bf16 %v1343_v27, %v1343_v27 }
 0x807   :  { %426 = vrot.lane.b32.xlu1 %v424_v28, %s1185_s11 }
 0x879   :  { %v427_v29 = vpop.permute.xlu1 %426 }
 0x87a   :  { %1029 = vmatmul.mubr.msk.bf16.vlgmr.msra.gmra.mrb[8].mxu1 %vm181_vm5, %v427_v29 }
 0x87b   :  { %1041 = vmatpush3.bf16.msra.mxu1 %v1234_v2  ;;  %1044 = vmatprep.mubr.msk.bf16.mxu1 %vm1182_vm1, %v1181_v1 }
 0x87c   :  { %1042 = vmatprep.subr.bf16.mxu1 %v1181_v1 }
 0x87f   :  { %1043 = vmatpush3.bf16.msra.mxu1 %v1248_v5 }
 0x880   :  { %1056 = vmatprep.subr.bf16.mxu1 %v1181_v1 }
 0x94d   :  { %v465_v31 = vpop.f32.mrb[8].mxu1 }
 0x94e   :  { %v471_v32 = vadd.f32 %v465_v31, %v130_v30  ;;  %v1030_v33 = vpop.f32.mrb[9].mxu1 }
 0x94f   :  { %v468_v35 = vpop.f32.mrb[10].mxu1 }
 0x950   :  { %v945_v36 = vmul.f32 -1.442695, %v471_v32  ;;  %v1031_v37 = vpop.f32.mrb[11].mxu1 }
 0x952   :  { %1113 = vpow2.f32 %v945_v36 }
 0x953   :  { %1115 = vtanh.f32 %v471_v32 }
 0x95c   :  { %v1114_v38 = vpop.eup %1113 }
 0x95d   :  { %v476_v39 = vadd.f32 1.0, %v1114_v38  ;;  %v1116_v40 = vpop.eup %1115 }
 0x95f   :  { %1117 = vrcp.f32 %v476_v39 }
 0x969   :  { %v1118_v41 = vpop.eup %1117 }
 0x96a   :  { %v479_v42 = vsel %vm1279_vm4, %v1116_v40, %v1118_v41 }
 0x96b   :  { %482 = vrot.lane.b32.xlu0 %v479_v42, %s1184_s4  ;;  %v480_v44 = vmul.f32 %v479_v42, %v408_v24 }
 0x9dd   :  { %v483_v43 = vpop.permute.xlu0 %482 }
 0x9de   :  { %v485_v11 = vmul.f32 %v483_v43, %v479_v42 }
 0x9e0   :  { %487 = vrot.lane.b32.xlu1 %v485_v11, %s1185_s11 }
 0xa52   :  { %v488_v45 = vpop.permute.xlu1 %487 }
 0xa53   :  { %v490_v46 = vadd.f32 %v488_v45, %v480_v44 }
 0xa55   :  { %1119 = vtanh.f32 %v490_v46 }
 0xa5f   :  { %v1120_v47 = vpop.eup %1119 }
 0xa60   :  { %493 = vrot.lane.b32.xlu0 %v1120_v47, %s1184_s4 }
 0xad2   :  { %v494_v48 = vpop.permute.xlu0 %493 }
 0xad3   :  { %v1362_v49 = vmul.f32 %v494_v48, %v479_v42  ;;  %v143_v42 = vadd.f32 %v1321_v60, %v1272_v7 }
 0xad5   :  { %v506_v50 = vpack.c.bf16 %v1362_v49, %v1362_v49 }
 0xad7   :  { %508 = vrot.lane.b32.xlu1 %v506_v50, %s1185_s11 }
 0xb49   :  { %v509_v51 = vpop.permute.xlu1 %508 }
 0xb4a   :  { %1037 = vmatmul.mubr.msk.bf16.vlgmr.msra.gmra.mrb[12].mxu0 %vm181_vm5, %v509_v51 }
 0xb4b   :  { %1049 = vmatpush3.bf16.msra.mxu0 %v1234_v2  ;;  %1052 = vmatprep.mubr.msk.bf16.mxu0 %vm1182_vm1, %v1181_v1 }
 0xb4c   :  { %1050 = vmatprep.subr.bf16.mxu0 %v1181_v1 }
 0xb4f   :  { %1051 = vmatpush3.bf16.msra.mxu0 %v1248_v5 }
 0xb50   :  { %1064 = vmatprep.subr.bf16.mxu0 %v1181_v1 }
 0xc1d   :  { %v547_v53 = vpop.f32.mrb[12].mxu0 }
 0xc1e   :  { %v553_v54 = vadd.f32 %v547_v53, %v135_v52  ;;  %v1038_v55 = vpop.f32.mrb[13].mxu0 }
 0xc1f   :  { %v550_v56 = vpop.f32.mrb[14].mxu0 }
 0xc20   :  { %v947_v57 = vmul.f32 -1.442695, %v553_v54  ;;  %v1039_v59 = vpop.f32.mrb[15].mxu0 }
 0xc22   :  { %1121 = vpow2.f32 %v947_v57 }
 0xc23   :  { %1123 = vtanh.f32 %v553_v54 }
 0xc2c   :  { %v1122_v0 = vpop.eup %1121 }
 0xc2d   :  { %v558_v3 = vadd.f32 1.0, %v1122_v0  ;;  %v1124_v4 = vpop.eup %1123 }
 0xc2f   :  { %1125 = vrcp.f32 %v558_v3 }
 0xc39   :  { %v1126_v9 = vpop.eup %1125 }
 0xc3a   :  { %v561_v10 = vsel %vm1279_vm4, %v1124_v4, %v1126_v9 }
 0xc3b   :  { %564 = vrot.lane.b32.xlu0 %v561_v10, %s1184_s4  ;;  %v562_v13 = vmul.f32 %v561_v10, %v490_v46 }
 0xcad   :  { %v565_v12 = vpop.permute.xlu0 %564 }
 0xcae   :  { %v567_v61 = vmul.f32 %v565_v12, %v561_v10 }
 0xcb0   :  { %569 = vrot.lane.b32.xlu1 %v567_v61, %s1185_s11 }
 0xd22   :  { %v570_v14 = vpop.permute.xlu1 %569 }
 0xd23   :  { %v572_v15 = vadd.f32 %v570_v14, %v562_v13 }
 0xd25   :  { %1127 = vtanh.f32 %v572_v15 }
 0xd2f   :  { %v1128_v16 = vpop.eup %1127 }
 0xd30   :  { %575 = vrot.lane.b32.xlu0 %v1128_v16, %s1184_s4 }
 0xda2   :  { %v576_v17 = vpop.permute.xlu0 %575 }
 0xda3   :  { %v1381_v18 = vmul.f32 %v576_v17, %v561_v10  ;;  %v146_v10 = vadd.f32 %v1325_v62, %v1272_v7 }
 0xda5   :  { %v588_v19 = vpack.c.bf16 %v1381_v18, %v1381_v18 }
 0xda7   :  { %590 = vrot.lane.b32.xlu1 %v588_v19, %s1185_s11 }
 0xe19   :  { %v591_v20 = vpop.permute.xlu1 %590 }
 0xe1a   :  { %1045 = vmatmul.mubr.msk.bf16.vlgmr.msra.gmra.mrb[12].mxu1 %vm181_vm5, %v591_v20  ;;  %v161_v20 = vld [vmem:[%s1470_s1] sm:$0xff] }
 0xe1b   :  { %1057 = vmatpush3.bf16.msra.mxu1 %v1234_v2  ;;  %1060 = vmatprep.mubr.msk.bf16.mxu1 %vm1182_vm1, %v1181_v1 }
 0xe1c   :  { %1058 = vmatprep.subr.bf16.mxu1 %v1181_v1 }
 0xe1f   :  { %1059 = vmatpush3.bf16.msra.mxu1 %v1248_v5 }
 0xeed   :  { %v629_v21 = vpop.f32.mrb[12].mxu1 }
 0xeee   :  { %v635_v22 = vadd.f32 %v629_v21, %v138_v8  ;;  %v1046_v24 = vpop.f32.mrb[13].mxu1  ;;  %v936_v8 = vadd.s32 4294967295, %v161_v20 }
 0xeef   :  { %v632_v25 = vpop.f32.mrb[14].mxu1 }
 0xef0   :  { %v949_v26 = vmul.f32 -1.442695, %v635_v22  ;;  %v1047_v28 = vpop.f32.mrb[15].mxu1  ;;  %vm251_vm6 = vcmp.eq.s32.totalorder %v936_v8, 0  ;;  %vm497_vm7 = vcmp.eq.s32.totalorder %v936_v8, 3  ;;  %vm661_vm8 = vcmp.eq.s32.totalorder %v936_v8, 5 }
 0xef1   :  { %v252_v62 = vsel %vm251_vm6, 1, %v1183_v6  ;;  %v498_v24 = vsel %vm497_vm7, 1, %v1183_v6  ;;  %v662_v25 = vsel %vm661_vm8, 1, %v1183_v6  ;;  %vm825_vm9 = vcmp.eq.s32.totalorder %v936_v8, 7 }
 0xef2   :  { %1129 = vpow2.f32 %v949_v26  ;;  %v826_v26 = vsel %vm825_vm9, 1, %v1183_v6  ;;  %vm333_vm10 = vcmp.eq.s32.totalorder %v936_v8, 1  ;;  %vm415_vm11 = vcmp.eq.s32.totalorder %v936_v8, 2 }
 0xef3   :  { %1131 = vtanh.f32 %v635_v22  ;;  %vm579_vm12 = vcmp.eq.s32.totalorder %v936_v8, 4  ;;  %vm743_vm13 = vcmp.eq.s32.totalorder %v936_v8, 6 }
 0xefc   :  { %v1130_v29 = vpop.eup %1129 }
 0xefd   :  { %v640_v30 = vadd.f32 1.0, %v1130_v29  ;;  %v1132_v2 = vpop.eup %1131  ;;  %v334_v29 = vsel %vm333_vm10, 1, %v1183_v6 }
 0xeff   :  { %1133 = vrcp.f32 %v640_v30  ;;  %v416_v30 = vsel %vm415_vm11, 1, %v1183_v6 }
 0xf09   :  { %v1134_v31 = vpop.eup %1133 }
 0xf0a   :  { %v643_v32 = vsel %vm1279_vm4, %v1132_v2, %v1134_v31  ;;  %v580_v2 = vsel %vm579_vm12, 1, %v1183_v6  ;;  %v744_v31 = vsel %vm743_vm13, 1, %v1183_v6 }
 0xf0b   :  { %646 = vrot.lane.b32.xlu0 %v643_v32, %s1184_s4  ;;  %v644_v33 = vmul.f32 %v643_v32, %v572_v15 }
 0xf7d   :  { %v647_v5 = vpop.permute.xlu0 %646 }
 0xf7e   :  { %v649_v63 = vmul.f32 %v647_v5, %v643_v32 }
 0xf80   :  { %651 = vrot.lane.b32.xlu1 %v649_v63, %s1185_s11 }
 0xff2   :  { %v652_v35 = vpop.permute.xlu1 %651 }
 0xff3   :  { %v654_v36 = vadd.f32 %v652_v35, %v644_v33  ;;  %v1087_v33 = vld [vmem:[%s1474_s5] sm:$0xff]   ;;  %v1088_v35 = vld [vmem:[%s1474_s5 + $0x8] sm:$0xff]  }
 0xff5   :  { %1135 = vtanh.f32 %v654_v36 }
 0xfff   :  { %v1136_v37 = vpop.eup %1135 }
0x1000   :  { %657 = vrot.lane.b32.xlu0 %v1136_v37, %s1184_s4 }
0x1072   :  { %v658_v38 = vpop.permute.xlu0 %657 }
0x1073   :  { %v1399_v39 = vmul.f32 %v658_v38, %v643_v32 }
0x1075   :  { %v670_v40 = vpack.c.bf16 %v1399_v39, %v1399_v39 }
0x1077   :  { %672 = vrot.lane.b32.xlu1 %v670_v40, %s1185_s11 }
0x10e9   :  { %v673_v41 = vpop.permute.xlu1 %672 }
0x10ea   :  { %1053 = vmatmul.mubr.msk.bf16.vlgmr.msra.gmra.mrb[16].mxu0 %vm181_vm5, %v673_v41 }
0x10eb   :  { %1068 = vmatprep.mubr.msk.bf16.mxu0 %vm1182_vm1, %v1181_v1  ;;  %1065 = vmatpush3.bf16.msra.mxu0 %v1087_v33 }
0x10ec   :  { %1066 = vmatprep.subr.bf16.mxu0 %v1181_v1 }
0x10ef   :  { %1067 = vmatpush3.bf16.msra.mxu0 %v1088_v35 }
0x11bd   :  { %v711_v43 = vpop.f32.mrb[16].mxu0 }
0x11be   :  { %v717_v11 = vadd.f32 %v711_v43, %v143_v42  ;;  %v1054_v44 = vpop.f32.mrb[17].mxu0 }
0x11bf   :  { %v714_v45 = vpop.f32.mrb[18].mxu0 }
0x11c0   :  { %v951_v46 = vmul.f32 -1.442695, %v717_v11  ;;  %v1055_v47 = vpop.f32.mrb[19].mxu0 }
0x11c2   :  { %1137 = vpow2.f32 %v951_v46 }
0x11c3   :  { %1139 = vtanh.f32 %v717_v11 }
0x11cc   :  { %v1138_v48 = vpop.eup %1137 }
0x11cd   :  { %v722_v50 = vadd.f32 1.0, %v1138_v48  ;;  %v1140_v51 = vpop.eup %1139 }
0x11cf   :  { %1141 = vrcp.f32 %v722_v50 }
0x11d9   :  { %v1142_v52 = vpop.eup %1141 }
0x11da   :  { %v725_v53 = vsel %vm1279_vm4, %v1140_v51, %v1142_v52 }
0x11db   :  { %728 = vrot.lane.b32.xlu0 %v725_v53, %s1184_s4  ;;  %v726_v55 = vmul.f32 %v725_v53, %v654_v36 }
0x124d   :  { %v729_v54 = vpop.permute.xlu0 %728 }
0x124e   :  { %v731_v60 = vmul.f32 %v729_v54, %v725_v53 }
0x1250   :  { %733 = vrot.lane.b32.xlu1 %v731_v60, %s1185_s11 }
0x12c2   :  { %v734_v56 = vpop.permute.xlu1 %733 }
0x12c3   :  { %v736_v57 = vadd.f32 %v734_v56, %v726_v55 }
0x12c5   :  { %1143 = vtanh.f32 %v736_v57 }
0x12cf   :  { %v1144_v59 = vpop.eup %1143 }
0x12d0   :  { %739 = vrot.lane.b32.xlu0 %v1144_v59, %s1184_s4 }
0x1342   :  { %v740_v0 = vpop.permute.xlu0 %739 }
0x1343   :  { %v1414_v3 = vmul.f32 %v740_v0, %v725_v53 }
0x1345   :  { %v752_v4 = vpack.c.bf16 %v1414_v3, %v1414_v3 }
0x1347   :  { %754 = vrot.lane.b32.xlu1 %v752_v4, %s1185_s11 }
0x13b9   :  { %v755_v9 = vpop.permute.xlu1 %754 }
0x13ba   :  { %1061 = vmatmul.mubr.msk.bf16.vlgmr.msra.gmra.mrb[16].mxu1 %vm181_vm5, %v755_v9 }
0x148d   :  { %v793_v12 = vpop.f32.mrb[16].mxu1 }
0x148e   :  { %v799_v61 = vadd.f32 %v793_v12, %v146_v10  ;;  %v1062_v13 = vpop.f32.mrb[17].mxu1 }
0x148f   :  { %v796_v14 = vpop.f32.mrb[18].mxu1 }
0x1490   :  { %v953_v15 = vmul.f32 -1.442695, %v799_v61  ;;  %v1063_v16 = vpop.f32.mrb[19].mxu1 }
0x1492   :  { %1145 = vpow2.f32 %v953_v15 }
0x1493   :  { %1147 = vtanh.f32 %v799_v61 }
0x149c   :  { %v1146_v17 = vpop.eup %1145 }
0x149d   :  { %v804_v19 = vadd.f32 1.0, %v1146_v17  ;;  %v1148_v21 = vpop.eup %1147 }
0x149f   :  { %1149 = vrcp.f32 %v804_v19 }
0x14a9   :  { %v1150_v22 = vpop.eup %1149 }
0x14aa   :  { %v807_v7 = vsel %vm1279_vm4, %v1148_v21, %v1150_v22 }
0x14ab   :  { %810 = vrot.lane.b32.xlu0 %v807_v7, %s1184_s4  ;;  %v808_v32 = vmul.f32 %v807_v7, %v736_v57 }
0x14af   :  { %254 = vperm.xlu0 %1078, %v252_v62  }
0x14b3   :  { %500 = vperm.xlu0 %1078, %v498_v24  }
0x14b7   :  { %664 = vperm.xlu0 %1078, %v662_v25  }
0x14bb   :  { %828 = vperm.xlu0 %1078, %v826_v26  }
0x151d   :  { %v811_v28 = vpop.permute.xlu0 %810 }
0x151e   :  { %v813_v23 = vmul.f32 %v811_v28, %v807_v7 }
0x1520   :  { %815 = vrot.lane.b32.xlu1 %v813_v23, %s1185_s11 }
0x1524   :  { %336 = vperm.xlu1 %1079, %v334_v29  }
0x1528   :  { %418 = vperm.xlu1 %1079, %v416_v30  }
0x152c   :  { %582 = vperm.xlu1 %1079, %v580_v2  }
0x152e   :  { %v255_v38 = vpop.permute.xlu0 %254 }
0x152f   :  { %vm256_vm14 = vcmp.eq.s32.totalorder %v255_v38, 1 }
0x1530   :  { %746 = vperm.xlu1 %1079, %v744_v31   ;;  %v257_v42 = vsel %vm256_vm14, %v1288_v34, 0.0 }
0x1532   :  { %v501_v40 = vpop.permute.xlu0 %500 }
0x1533   :  { %vm502_vm1 = vcmp.eq.s32.totalorder %v501_v40, 1 }
0x1536   :  { %v665_v1 = vpop.permute.xlu0 %664 }
0x1537   :  { %vm666_vm3 = vcmp.eq.s32.totalorder %v665_v1, 1 }
0x153a   :  { %v829_v47 = vpop.permute.xlu0 %828 }
0x153b   :  { %vm830_vm6 = vcmp.eq.s32.totalorder %v829_v47, 1 }
0x1592   :  { %v816_v5 = vpop.permute.xlu1 %815 }
0x1593   :  { %v818_v63 = vadd.f32 %v816_v5, %v808_v32 }
0x1595   :  { %1151 = vtanh.f32 %v818_v63 }
0x159f   :  { %v1152_v36 = vpop.eup %1151 }
0x15a0   :  { %821 = vrot.lane.b32.xlu1 %v1152_v36, %s1184_s4 }
0x15a3   :  { %v337_v6 = vpop.permute.xlu1 %336 }
0x15a4   :  { %vm338_vm15 = vcmp.eq.s32.totalorder %v337_v6, 1 }
0x15a5   :  { %v339_v43 = vsel %vm338_vm15, %v1316_v58, %v257_v42 }
0x15a7   :  { %v419_v37 = vpop.permute.xlu1 %418 }
0x15a8   :  { %vm420_vm0 = vcmp.eq.s32.totalorder %v419_v37, 1 }
0x15a9   :  { %v421_v11 = vsel %vm420_vm0, %v1343_v27, %v339_v43 }
0x15aa   :  { %v503_v45 = vsel %vm502_vm1, %v1362_v49, %v421_v11  ;;  %v954_v49 = vld [vmem:[%s1475_s6] ss:$0 sm:$0xff]  ;;  %s1157_s6 = scalar_lea.vmem %s919_s22, 128 }
0x15ab   :  { %v583_v41 = vpop.permute.xlu1 %582  ;;  %p1158_p0 = scmp.ne.s32.totalorder %s919_s22, %s1157_s6  ;;  %p1163_p2 = scmp.lt.s32.totalorder %s1157_s6, %s1157_s6 }
0x15ac   :  { %vm584_vm2 = vcmp.eq.s32.totalorder %v583_v41, 1 }
0x15ad   :  { %v585_v46 = vsel %vm584_vm2, %v1381_v18, %v503_v45  ;;  %p1164_p3 = por %p1163_p2, %p1162_p1 }
0x15ae   :  { %v667_v50 = vsel %vm666_vm3, %v1399_v39, %v585_v46 }
0x15af   :  { %v747_v44 = vpop.permute.xlu1 %746  ;;  %p1165_p4 = pnand %p1164_p3, %p1158_p0 }
0x15b0   :  { %vm748_vm4 = vcmp.eq.s32.totalorder %v747_v44, 1 }
0x15b1   :  { %v749_v34 = vsel %vm748_vm4, %v1414_v3, %v667_v50 }
0x1612   :  { %v822_v48 = vpop.permute.xlu1 %821 }
0x1613   :  { %v824_v51 = vmul.f32 %v822_v48, %v807_v7 }
0x1615   :  { %v831_v58 = vsel %vm830_vm6, %v824_v51, %v749_v34 }
0x1616   :  { %v832_v27 = vpack.c.bf16 %v831_v58, %v831_v58 }
0x1618   :  { %845 = vrot.lane.b32.xlu0 %v832_v27, %s1185_s11 }
0x168a   :  { %v846_v52 = vpop.permute.xlu0 %845 }
0x168b   :  { %1069 = vmatmul.mubr.msk.bf16.vlgmr.msra.gmra.mrb[20].mxu0 %vm181_vm5, %v846_v52 }
0x175e   :  { %v896_v18 = vpop.f32.mrb[20].mxu0 }
0x175f   :  { %v897_v53 = vadd.f32 %v954_v49, %v896_v18  ;;  %v1070_v54 = vpop.f32.mrb[21].mxu0 }
0x1760   :  { %v899_v60 = vpop.f32.mrb[22].mxu0 }
0x1761   :  { %902 = vmax.xlane.f32.xlu1 %v897_v53  ;;  %v1071_v39 = vpop.f32.mrb[23].mxu0 }
0x17ee   :  { %v903_v55 = vpop.xlane.xlu1 %902 }
0x17ef   :  { %v904_v56 = vsub.f32 %v897_v53, %v903_v55 }
0x17f1   :  { %v905_v57 = vmul.f32 1.442695, %v904_v56 }
0x17f3   :  { %1153 = vpow2.f32 %v905_v57 }
0x17fd   :  { %v1154_v59 = vpop.eup %1153 }
0x17fe   :  { %907 = vadd.xlane.f32.xlu0 %v1154_v59 }
0x188b   :  { %v908_v0 = vpop.xlane.xlu0 %907 }
0x188c   :  { %1155 = vrcp.f32 %v908_v0 }
0x1896   :  { %v1156_v3 = vpop.eup %1155 }
0x1897   :  { %v910_v4 = vmul.f32 %v1156_v3, %v1154_v59 }
0x1899   :  { %911 = vst [vmem:[#allocation3] sm:$0xff] %v910_v4 }
0x189a   :  { %1168 = shalt.err (!%p1165_p4)
}
0x189b   :  { %s1169_s25 = scalar_lea.hbm %s1476_s7, 128 }
0x189c   :  { %p1170_p5 = scmp.ne.s32.totalorder %s1476_s7, %s1169_s25  ;;  %p1173_p6 = scmp.lt.u32.totalorder %s1169_s25, %s1476_s7 }
0x189e   :  { %p1175_p7 = pnand %p1173_p6, %p1170_p5 }
0x18a0   :  { %1178 = shalt.err (!%p1175_p7)
}
0x18a1   :  { %921 = dma.vmem_to_hbm [thread:$0]  %s919_s22, 128, %s1476_s7, [#allocation4]  }
0x18a2   :  { %1179 = dma.done.wait [#allocation4], 128  }
0x18a3   :  { %1180 = vsyncadd [#allocation4], 4294967168 }
0x18a4   :  { %925 = vsyncpa [#allocation4], 1 }

</bundles_post_ra>
